<compile_context>
chip_gen: v6e
topology: v6e:2x2x1
jax: 0.10.0
libtpu: 0.0.40
codegen_flags: <defaults>
</compile_context>

<pallas_src>
import math

import jax
import jax.numpy as jnp
from jax import lax
from jax.experimental import pallas as pl
from jax.experimental.pallas import tpu as pltpu

_LANE = 128
_SUBLANE = 8


def _round_up(x, m):
    return ((x + m - 1) // m) * m


# --------------------------------------------------------------------------
# Kernels
# --------------------------------------------------------------------------

def _td_dense_kernel(d_ref, w_ref, b_ref, o_ref):
    # d_ref: (TB, In)  w_ref: (OutPad, In)  b_ref: (1, OutPad)  o_ref: (TB, OutPad)
    # Contract d's feature dim with W's feature dim (== d @ W.T) on the MXU,
    # accumulate in f32.  Bias / relu / exp stay in-kernel: VPU/EUP filler
    # while the MXU result drains.
    acc = lax.dot_general(
        d_ref[...], w_ref[...],
        dimension_numbers=(((1,), (1,)), ((), ())),
        preferred_element_type=jnp.float32)
    x = acc + b_ref[...]                                   # broadcast over rows
    o_ref[...] = jnp.exp(jnp.minimum(-x, 0.0)).astype(o_ref.dtype)  # exp(-relu(x))


def _td_diag_kernel(d_ref, w_ref, b_ref, o_ref):
    # diag=True: identity-masked linear == elementwise scale.  Pure VPU/EUP.
    # d_ref: (TB, NPad)  w_ref, b_ref: (1, NPad)  o_ref: (TB, NPad)
    x = d_ref[...] * w_ref[...] + b_ref[...]
    o_ref[...] = jnp.exp(jnp.minimum(-x, 0.0)).astype(o_ref.dtype)


# --------------------------------------------------------------------------
# One-time parameter preparation (weights are static; hoist out of the step)
# --------------------------------------------------------------------------

def prepare_dense_params(W, b):
    """Pad (out, in) weight / bias so the output lane dim is a multiple of 128."""
    out_size, in_size = W.shape
    out_pad = _round_up(out_size, _LANE)
    W_pad = jnp.zeros((out_pad, in_size), W.dtype).at[:out_size, :].set(W)
    b_pad = jnp.zeros((1, out_pad), jnp.float32).at[0, :out_size].set(
        b.astype(jnp.float32))
    return W_pad, b_pad, out_size


def prepare_diag_params(W, b):
    """diag=True uses only diag(W): extract it once, pad to lane width."""
    out_size, in_size = W.shape
    assert in_size == out_size, "diag=True requires input_size == output_size"
    n_pad = _round_up(out_size, _LANE)
    w_diag = jnp.diagonal(W).astype(jnp.float32)
    w_pad = jnp.zeros((1, n_pad), jnp.float32).at[0, :out_size].set(w_diag)
    b_pad = jnp.zeros((1, n_pad), jnp.float32).at[0, :out_size].set(
        b.astype(jnp.float32))
    return w_pad, b_pad, out_size


# --------------------------------------------------------------------------
# Forward wrappers
# --------------------------------------------------------------------------

def temporal_decay_dense(d, W_pad, b_pad, out_size, *,
                         compute_dtype=jnp.float32, block_b=512):
    """gamma = exp(-relu(d @ W.T + b)), dense weight path."""
    B, in_size = d.shape
    out_pad = W_pad.shape[0]

    if d.dtype != compute_dtype:
        d = d.astype(compute_dtype)      # bf16 inputs halve HBM read traffic
    if W_pad.dtype != compute_dtype:
        W_pad = W_pad.astype(compute_dtype)

    tb = min(block_b, _round_up(B, _SUBLANE))
    b_rows = _round_up(B, tb)
    if b_rows != B:
        d = jnp.pad(d, ((0, b_rows - B), (0, 0)))
    grid = (b_rows // tb,)

    out = pl.pallas_call(
        _td_dense_kernel,
        out_shape=jax.ShapeDtypeStruct((b_rows, out_pad), jnp.float32),
        grid_spec=pltpu.PrefetchScalarGridSpec(
            num_scalar_prefetch=0,
            grid=grid,
            in_specs=[
                pl.BlockSpec((tb, in_size), lambda i: (i, 0)),       # d tiled
                pl.BlockSpec((out_pad, in_size), lambda i: (0, 0)),  # W resident
                pl.BlockSpec((1, out_pad), lambda i: (0, 0)),        # b resident
            ],
            out_specs=pl.BlockSpec((tb, out_pad), lambda i: (i, 0)),
        ),
        compiler_params=pltpu.CompilerParams(
            dimension_semantics=("parallel",)),
    )(d, W_pad, b_pad)
    return out[:B, :out_size]


def temporal_decay_diag(d, w_pad, b_pad, out_size, *, block_b=512):
    """gamma = exp(-relu(d * diag(W) + b)), identity-masked (diag=True) path."""
    B, in_size = d.shape
    n_pad = w_pad.shape[1]

    d = d.astype(jnp.float32)
    tb = min(block_b, _round_up(B, _SUBLANE))
    b_rows = _round_up(B, tb)
    if b_rows != B or in_size != n_pad:
        d = jnp.pad(d, ((0, b_rows - B), (0, n_pad - in_size)))
    grid = (b_rows // tb,)

    out = pl.pallas_call(
        _td_diag_kernel,
        out_shape=jax.ShapeDtypeStruct((b_rows, n_pad), jnp.float32),
        grid_spec=pltpu.PrefetchScalarGridSpec(
            num_scalar_prefetch=0,
            grid=grid,
            in_specs=[
                pl.BlockSpec((tb, n_pad), lambda i: (i, 0)),   # d tiled
                pl.BlockSpec((1, n_pad), lambda i: (0, 0)),    # diag(W) resident
                pl.BlockSpec((1, n_pad), lambda i: (0, 0)),    # b resident
            ],
            out_specs=pl.BlockSpec((tb, n_pad), lambda i: (i, 0)),
        ),
        compiler_params=pltpu.CompilerParams(
            dimension_semantics=("parallel",)),
    )(d, w_pad, b_pad)
    return out[:B, :out_size]


def temporal_decay(d, W, b, diag=False, *, compute_dtype=jnp.float32):
    """One-shot forward matching TemporalDecay.forward.

    For repeated calls (RITS time unroll), call prepare_*_params once and use
    temporal_decay_dense / temporal_decay_diag directly instead.
    """
    if diag:
        w_pad, b_pad, out_size = prepare_diag_params(W, b)
        return temporal_decay_diag(d, w_pad, b_pad, out_size)
    W_pad, b_pad, out_size = prepare_dense_params(W, b)
    return temporal_decay_dense(d, W_pad, b_pad, out_size,
                                compute_dtype=compute_dtype)


def init_params(key, input_size, output_size):
    """Deterministic init mirroring TemporalDecay.reset_parameters()."""
    stdv = 1.0 / math.sqrt(output_size)
    kW, kb = jax.random.split(key)
    W = jax.random.uniform(kW, (output_size, input_size), jnp.float32,
                           minval=-stdv, maxval=stdv)
    b = jax.random.uniform(kb, (output_size,), jnp.float32,
                           minval=-stdv, maxval=stdv)
    return W, b


if __name__ == "__main__":
    key = jax.random.PRNGKey(0)
    k_d, k_p, k_big = jax.random.split(key, 3)

    batch, input_size, output_size = 8, 32, 32   # diag mode requires in == out

    d = jax.random.uniform(k_d, (batch, input_size), jnp.float32)  # deltas >= 0
    W, b = init_params(k_p, input_size, output_size)

    # One-time, hoisted parameter prep (padding / diag extraction).
    W_pad, b_pad, out_size = prepare_dense_params(W, b)
    wdiag_pad, bdiag_pad, _ = prepare_diag_params(W, b)

    # Dense path, f32.
    gamma = jax.block_until_ready(
        temporal_decay_dense(d, W_pad, b_pad, out_size))
    # Diag path (elementwise, no matmul, no dense eye).
    gamma_diag = jax.block_until_ready(
        temporal_decay_diag(d, wdiag_pad, bdiag_pad, out_size))
    # Dense path with bf16 matmul inputs (f32 accumulate + f32 epilogue).
    gamma_bf16 = jax.block_until_ready(
        temporal_decay_dense(d, W_pad, b_pad, out_size,
                             compute_dtype=jnp.bfloat16))
    # Multi-block batch grid (grid=4, ragged last tile padded then sliced).
    d_big = jax.random.uniform(k_big, (200, input_size), jnp.float32)
    gamma_big = jax.block_until_ready(
        temporal_decay_dense(d_big, W_pad, b_pad, out_size, block_b=64))

    # Plain-JAX references (match the PyTorch module semantics).
    ref = jnp.exp(-jax.nn.relu(d @ W.T + b))
    ref_diag = jnp.exp(-jax.nn.relu(d * jnp.diagonal(W) + b))
    ref_big = jnp.exp(-jax.nn.relu(d_big @ W.T + b))

    assert jnp.allclose(gamma, ref, atol=1e-5, rtol=1e-5)
    assert jnp.allclose(gamma_diag, ref_diag, atol=1e-5, rtol=1e-5)
    assert jnp.allclose(gamma_big, ref_big, atol=1e-5, rtol=1e-5)
    assert jnp.allclose(gamma_bf16, ref, atol=3e-2, rtol=3e-2)

    print("KERNEL_OK")
</pallas_src>

<mosaic_0001>
module attributes {stable_mosaic.version = 11 : i64} {
  func.func @_td_dense_kernel(%arg0: i32, %arg1: memref<8x32xf32, #tpu.memory_space<vmem>>, %arg2: memref<128x32xf32, #tpu.memory_space<vmem>>, %arg3: memref<1x128xf32, #tpu.memory_space<vmem>>, %arg4: memref<8x128xf32, #tpu.memory_space<vmem>>) attributes {dimension_semantics = [#tpu.dimension_semantics<parallel>], iteration_bounds = array<i64: 1>, scalar_prefetch = 0 : i64, scratch_operands = 0 : i64, tpu.core_type = #tpu.core_type<tc>, window_params = [{transform_indices = @transform_0, window_bounds = array<i64: 8, 32>}, {pipeline_mode = #tpu.pipeline_mode<synchronous>, transform_indices = @transform_1, window_bounds = array<i64: 128, 32>}, {pipeline_mode = #tpu.pipeline_mode<synchronous>, transform_indices = @transform_2, window_bounds = array<i64: 1, 128>}, {transform_indices = @transform_3, window_bounds = array<i64: 8, 128>}]} {
    %c0 = arith.constant 0 : index
    %c0_0 = arith.constant 0 : index
    %0 = vector.load %arg1[%c0, %c0_0] : memref<8x32xf32, #tpu.memory_space<vmem>>, vector<8x32xf32>
    %c0_1 = arith.constant 0 : index
    %c0_2 = arith.constant 0 : index
    %1 = vector.load %arg2[%c0_1, %c0_2] : memref<128x32xf32, #tpu.memory_space<vmem>>, vector<128x32xf32>
    %cst = arith.constant dense<0.000000e+00> : vector<8x128xf32>
    %2 = tpu.matmul %0, %1, %cst {dimension_numbers = #tpu.dot_dimension_numbers<[1], [1], [0], [0], [0, 0, 1, 0], [], []>} : vector<8x32xf32>, vector<128x32xf32>, vector<8x128xf32> -> vector<8x128xf32>
    %c0_3 = arith.constant 0 : index
    %c0_4 = arith.constant 0 : index
    %3 = vector.load %arg3[%c0_3, %c0_4] : memref<1x128xf32, #tpu.memory_space<vmem>>, vector<1x128xf32>
    %4 = vector.broadcast %3 : vector<1x128xf32> to vector<8x128xf32>
    %5 = arith.addf %2, %4 : vector<8x128xf32>
    %cst_5 = arith.constant 0.000000e+00 : f32
    %6 = vector.broadcast %cst_5 : f32 to vector<8x128xf32>
    %7 = arith.subf %6, %5 : vector<8x128xf32>
    %cst_6 = arith.constant 0.000000e+00 : f32
    %8 = vector.broadcast %cst_6 : f32 to vector<8x128xf32>
    %9 = arith.minimumf %7, %8 : vector<8x128xf32>
    %10 = math.exp %9 : vector<8x128xf32>
    %c0_7 = arith.constant 0 : index
    %c0_8 = arith.constant 0 : index
    %11 = vector.load %arg4[%c0_7, %c0_8] : memref<8x128xf32, #tpu.memory_space<vmem>>, vector<8x128xf32>
    tpu.vector_store %arg4[%c0_7, %c0_8], %10 {strides = array<i32>} : memref<8x128xf32, #tpu.memory_space<vmem>>, vector<8x128xf32>,
    return
  }
  func.func @transform_0(%arg0: i32) -> (i32, i32) {
    %c0_i32 = arith.constant 0 : i32
    %c0_i32_0 = arith.constant 0 : i32
    return %arg0, %c0_i32 : i32, i32
  }
  func.func @transform_1(%arg0: i32) -> (i32, i32) {
    %c0_i32 = arith.constant 0 : i32
    %c0_i32_0 = arith.constant 0 : i32
    %c0_i32_1 = arith.constant 0 : i32
    return %c0_i32, %c0_i32_0 : i32, i32
  }
  func.func @transform_2(%arg0: i32) -> (i32, i32) {
    %c0_i32 = arith.constant 0 : i32
    %c0_i32_0 = arith.constant 0 : i32
    %c0_i32_1 = arith.constant 0 : i32
    return %c0_i32, %c0_i32_0 : i32, i32
  }
  func.func @transform_3(%arg0: i32) -> (i32, i32) {
    %c0_i32 = arith.constant 0 : i32
    %c0_i32_0 = arith.constant 0 : i32
    return %arg0, %c0_i32 : i32, i32
  }
}

</mosaic_0001>

<bundles_post_ra>
// kernel: tpu_custom_call.1
= control target key start
LH: loop header
LB: loop body
LE: loop exit
PB: predicated region body
PF: predicated region fallthrough
CT: control target
= control target key end

     0   :  { %vm39_vm0 = vcmask 261120   ;;  %v277_v1 = vmov 0.0   ;;  %vm278_vm1 = vmmov 0   ;;  %s374_s0 = inlined_call_operand.vmem [shape: f32[8,32], index: 0, kind: input, shape index: {}]   ;;  %s375_s1 = inlined_call_operand.vmem [shape: f32[128,32], index: 1, kind: input, shape index: {}]   ;;  %s376_s2 = inlined_call_operand.vmem [shape: f32[1,128], index: 2, kind: input, shape index: {}]   ;;  %s377_s3 = inlined_call_operand.hbm [shape: f32[8,128], index: 3, kind: output, shape index: {}]  }
   0x1   :  { %v31_v0 = vld [vmem:[%s375_s1 + $0x78] sm:$0xff]  ;;  %215 = vmatprep.subr.mxu0 %v277_v1  ;;  %247 = vmatprep.mubr.msk.f32.mxu0 %vm278_vm1, %v277_v1  ;;  %v30_v2 = vld [vmem:[%s375_s1 + $0x70] sm:$0xff] }
   0x2   :  { %216 = vmatpush3.xpose.msk.msra.mxu0 %vm39_vm0, %v31_v0 }
   0x3   :  { %217 = vmatprep.subr.mxu0 %v277_v1 }
   0x6   :  { %218 = vmatpush3.xpose.msk.msra.mxu0 %vm39_vm0, %v30_v2 }
   0x7   :  { %8 = vsyncpa [#allocation3], 0  ;;  %219 = vmatprep.subr.mxu0 %v277_v1  ;;  %v29_v3 = vld [vmem:[%s375_s1 + $0x68] sm:$0xff]  ;;  %v28_v4 = vld [vmem:[%s375_s1 + $0x60] sm:$0xff] }
   0x8   :  { %v27_v5 = vld [vmem:[%s375_s1 + $0x58] sm:$0xff]  ;;  %v26_v6 = vld [vmem:[%s375_s1 + $0x50] sm:$0xff]  ;;  %v25_v7 = vld [vmem:[%s375_s1 + $0x48] sm:$0xff] }
   0x9   :  { %v24_v8 = vld [vmem:[%s375_s1 + $0x40] sm:$0xff]  ;;  %v23_v9 = vld [vmem:[%s375_s1 + $0x38] sm:$0xff]  ;;  %v22_v10 = vld [vmem:[%s375_s1 + $0x30] sm:$0xff] }
   0xa   :  { %220 = vmatpush3.xpose.msk.msra.mxu0 %vm39_vm0, %v29_v3  ;;  %v21_v11 = vld [vmem:[%s375_s1 + $0x28] sm:$0xff]  ;;  %v20_v12 = vld [vmem:[%s375_s1 + $0x20] sm:$0xff]  ;;  %v19_v13 = vld [vmem:[%s375_s1 + $0x18] sm:$0xff] }
   0xb   :  { %221 = vmatprep.subr.mxu0 %v277_v1  ;;  %v18_v14 = vld [vmem:[%s375_s1 + $0x10] sm:$0xff]  ;;  %v17_v15 = vld [vmem:[%s375_s1 + $0x8] sm:$0xff]  ;;  %v16_v16 = vld [vmem:[%s375_s1] sm:$0xff]  ;;  %s279_s1 = smov [#allocation2]  }
   0xc   :  { %v15_v17 = vld [vmem:[%s374_s0] sm:$0xff]  ;;  %s172_s21 = sshll.u32 %s279_s1, 4  ;;  %s173_s21 = int_to_ptr.vmem [resolvable:$true] %s172_s21 }
   0xd   :  { %v180_v18 = vld [vmem:[%s376_s2] ss:$0 sm:$0xff]  ;;  %s255_s22 = scalar_lea.vmem %s173_s21, 128  ;;  %p260_p1 = scmp.lt.s32.totalorder %s173_s21, %s173_s21 }
   0xe   :  { %222 = vmatpush3.xpose.msk.msra.mxu0 %vm39_vm0, %v28_v4  ;;  %p256_p0 = scmp.ne.s32.totalorder %s173_s21, %s255_s22  ;;  %p261_p2 = scmp.lt.s32.totalorder %s255_s22, %s255_s22 }
   0xf   :  { %223 = vmatprep.subr.mxu0 %v277_v1 }
  0x10   :  { %p262_p3 = por %p261_p2, %p260_p1 }
  0x12   :  { %224 = vmatpush3.xpose.msk.msra.mxu0 %vm39_vm0, %v27_v5  ;;  %p263_p4 = pnand %p262_p3, %p256_p0 }
  0x13   :  { %225 = vmatprep.subr.mxu0 %v277_v1 }
  0x16   :  { %226 = vmatpush3.xpose.msk.msra.mxu0 %vm39_vm0, %v26_v6 }
  0x17   :  { %227 = vmatprep.subr.mxu0 %v277_v1 }
  0x1a   :  { %228 = vmatpush3.xpose.msk.msra.mxu0 %vm39_vm0, %v25_v7 }
  0x1b   :  { %229 = vmatprep.subr.mxu0 %v277_v1 }
  0x1e   :  { %230 = vmatpush3.xpose.msk.msra.mxu0 %vm39_vm0, %v24_v8 }
  0x1f   :  { %231 = vmatprep.subr.mxu0 %v277_v1 }
  0x22   :  { %232 = vmatpush3.xpose.msk.msra.mxu0 %vm39_vm0, %v23_v9 }
  0x23   :  { %233 = vmatprep.subr.mxu0 %v277_v1 }
  0x26   :  { %234 = vmatpush3.xpose.msk.msra.mxu0 %vm39_vm0, %v22_v10 }
  0x27   :  { %235 = vmatprep.subr.mxu0 %v277_v1 }
  0x2a   :  { %236 = vmatpush3.xpose.msk.msra.mxu0 %vm39_vm0, %v21_v11 }
  0x2b   :  { %237 = vmatprep.subr.mxu0 %v277_v1 }
  0x2e   :  { %238 = vmatpush3.xpose.msk.msra.mxu0 %vm39_vm0, %v20_v12 }
  0x2f   :  { %239 = vmatprep.subr.mxu0 %v277_v1 }
  0x32   :  { %240 = vmatpush3.xpose.msk.msra.mxu0 %vm39_vm0, %v19_v13 }
  0x33   :  { %241 = vmatprep.subr.mxu0 %v277_v1 }
  0x36   :  { %242 = vmatpush3.xpose.msk.msra.mxu0 %vm39_vm0, %v18_v14 }
  0x37   :  { %243 = vmatprep.subr.mxu0 %v277_v1 }
  0x3a   :  { %244 = vmatpush3.xpose.msk.msra.mxu0 %vm39_vm0, %v17_v15 }
  0x3b   :  { %245 = vmatprep.subr.mxu0 %v277_v1 }
  0x3e   :  { %246 = vmatpush3.xpose.msk.msra.mxu0 %vm39_vm0, %v16_v16 }
  0x41   :  { %248 = vmatmul.mubr.msk.f32.vlgmr.msra.gmra.mxu0 %vm39_vm0, %v15_v17 }
 0x101   :  { %v157_v19 = vpop.f32.mrf.mxu0 }
 0x102   :  { %v158_v20 = vadd.f32 %v180_v18, %v157_v19 }
 0x103   :  { %v249_v21 = vpop.f32.mrf.mxu0 }
 0x104   :  { %v161_v22 = vsub.f32 0.0, %v158_v20 }
 0x106   :  { %v162_v23 = vmin.f32 %v161_v22, 0.0 }
 0x108   :  { %v163_v24 = vmul.f32 1.442695, %v162_v23 }
 0x10a   :  { %253 = vpow2.f32 %v163_v24 }
 0x117   :  { %v254_v25 = vpop.eup %253 }
 0x118   :  { %165 = vst [vmem:[#allocation2] sm:$0xff] %v254_v25 }
 0x119   :  { %266 = shalt.err (!%p263_p4)
}
 0x11a   :  { %175 = dma.vmem_to_hbm [thread:$0]  %s173_s21, 128, %s377_s3, [#allocation3]  }
 0x11b   :  { %275 = dma.done.wait [#allocation3], 128  }
 0x11c   :  { %276 = vsyncadd [#allocation3], 4294967168 }
 0x11d   :  { %179 = vsyncpa [#allocation3], 1 }

</bundles_post_ra>
